<compile_context>
chip_gen: v7x
topology: tpu7x:2x2x1
jax: 0.10.0
libtpu: 0.0.40
codegen_flags: <defaults>
</compile_context>

<pallas_src>
import functools

import jax
import jax.numpy as jnp
from jax.experimental import pallas as pl
from jax.experimental.pallas import tpu as pltpu


def _resnet_block_kernel(
    x_ref,       # (T_TILE, C)      f32 input rows (time-major, NWC)
    w1t_ref,     # (C, 2C)          bf16 conv1 weight^T, BN1 scale folded in
    w2t_ref,     # (2C, C)          bf16 conv2 weight^T, BN2 scale folded in
    b1_ref,      # (1, 2C)          f32 BN1 shift
    b2_ref,      # (1, C)           f32 BN2 shift
    alpha_ref,   # (2,)   SMEM      f32 PReLU alphas (part1, part2)
    o_ref,       # (T_TILE//3, C)   f32 pooled output rows
    y_scr,       # (T_TILE, C)      f32 VMEM scratch for pre-pool activations
):
    x = x_ref[...]                                              # f32, kept for residual

    # ---- part1: 1x1 conv (bf16 MXU, f32 acc) -> BN shift -> PReLU ----
    h = jnp.dot(x.astype(jnp.bfloat16), w1t_ref[...],
                preferred_element_type=jnp.float32)             # (T_TILE, 2C)
    h = h + b1_ref[...]
    a1 = alpha_ref[0]
    h = jnp.where(h > 0, h, a1 * h)

    # ---- second 1x1 conv -> BN shift ----
    y = jnp.dot(h.astype(jnp.bfloat16), w2t_ref[...],
                preferred_element_type=jnp.float32)             # (T_TILE, C)
    y = y + b2_ref[...]

    # ---- residual add (f32) + part2 PReLU ----
    y = y + x
    a2 = alpha_ref[1]
    y = jnp.where(y > 0, y, a2 * y)

    # ---- MaxPool1d(3): strided sublane reads + elementwise max (VPU) ----
    y_scr[...] = y
    t_out = o_ref.shape[0]
    y0 = y_scr[pl.ds(0, t_out, stride=3), :]
    y1 = y_scr[pl.ds(1, t_out, stride=3), :]
    y2 = y_scr[pl.ds(2, t_out, stride=3), :]
    o_ref[...] = jnp.maximum(jnp.maximum(y0, y1), y2)


def _choose_t_tile(t_pool, c, t_tile_cap):
    """Pick a time-tile: a multiple of 24 (3-pool x 8 sublanes) whose f32
    working set stays well inside v7x's smaller scoped VMEM budget."""
    per_row = 6 * c * 4                       # bytes/row: x (x2 dbl-buf) + h(2C) + scratch + out
    vmem_cap = max(24, (8 * 1024 * 1024 // max(per_row, 1)) // 24 * 24)
    cap = max(24, min(vmem_cap, (t_tile_cap // 24) * 24))
    if t_pool <= cap:
        return max(24, -(-t_pool // 24) * 24)  # round up to a multiple of 24
    return cap


@functools.partial(jax.jit, static_argnames=("t_tile_cap",))
def resnet_block_forward(x_nct, params, t_tile_cap=3072):
    """x_nct: (B, C, T) float32, PyTorch NCW layout. Returns (B, C, T//3)."""
    B, C, T = x_nct.shape
    C2 = 2 * C
    T_out = T // 3
    T_pool = 3 * T_out
    w1t, w2t, b1, b2, alphas = params

    t_tile = _choose_t_tile(T_pool, C, t_tile_cap)
    t_pad = -(-T_pool // t_tile) * t_tile
    t_out_tile = t_tile // 3

    # NCW -> NWC glue, drop the maxpool tail, pad each batch segment up to a
    # multiple of the tile (pad rows yield garbage that is sliced off below;
    # windows stay aligned since both T_pool and t_pad are multiples of 3).
    x_ntc = jnp.transpose(x_nct, (0, 2, 1))[:, :T_pool]
    if t_pad != T_pool:
        x_ntc = jnp.pad(x_ntc, ((0, 0), (0, t_pad - T_pool), (0, 0)))

    rows = B * t_pad
    x_rows = x_ntc.reshape(rows, C)
    out_rows = rows // 3
    grid = (rows // t_tile,)

    out = pl.pallas_call(
        _resnet_block_kernel,
        out_shape=jax.ShapeDtypeStruct((out_rows, C), jnp.float32),
        grid_spec=pltpu.PrefetchScalarGridSpec(
            num_scalar_prefetch=0,
            grid=grid,
            in_specs=[
                pl.BlockSpec((t_tile, C), lambda i: (i, 0)),        # x rows
                pl.BlockSpec((C, C2), lambda i: (0, 0)),            # w1^T (bf16)
                pl.BlockSpec((C2, C), lambda i: (0, 0)),            # w2^T (bf16)
                pl.BlockSpec((1, C2), lambda i: (0, 0)),            # BN1 shift
                pl.BlockSpec((1, C), lambda i: (0, 0)),             # BN2 shift
                pl.BlockSpec(memory_space=pltpu.MemorySpace.SMEM),  # PReLU alphas
            ],
            out_specs=pl.BlockSpec((t_out_tile, C), lambda i: (i, 0)),
            scratch_shapes=[pltpu.VMEM((t_tile, C), jnp.float32)],
        ),
        compiler_params=pltpu.CompilerParams(
            dimension_semantics=("parallel",),
            # Tiles are sized (<= ~8 MiB working set) to fit comfortably in the
            # conservative 32 MiB scoped limit, which is safe on v7x's 64 MiB VMEM.
            vmem_limit_bytes=32 * 1024 * 1024,
        ),
    )(x_rows, w1t, w2t, b1, b2, alphas)

    out = out.reshape(B, t_pad // 3, C)[:, :T_out]
    return jnp.transpose(out, (0, 2, 1))                            # back to NCW


def make_params(key, C):
    """Deterministic synthetic parameters matching the module's shapes, with
    eval-mode BatchNorm folded into per-channel scale/shift and the scales
    folded into bf16 conv weights."""
    C2 = 2 * C
    k = jax.random.split(key, 8)
    # Conv1d weights: (out_ch, in_ch, 1) in PyTorch -> 2D here.
    w1 = jax.random.normal(k[0], (C2, C), jnp.float32) * 0.3        # conv1
    w2 = jax.random.normal(k[1], (C, C2), jnp.float32) * 0.3        # conv2
    # BatchNorm (eval-mode) params + running stats.
    g1 = 1.0 + 0.1 * jax.random.normal(k[2], (C2,), jnp.float32)
    be1 = 0.1 * jax.random.normal(k[3], (C2,), jnp.float32)
    rm1 = 0.1 * jax.random.normal(k[4], (C2,), jnp.float32)
    rv1 = jnp.abs(1.0 + 0.1 * jax.random.normal(k[5], (C2,), jnp.float32))
    g2 = 1.0 + 0.1 * jax.random.normal(k[6], (C,), jnp.float32)
    be2 = 0.1 * jax.random.normal(k[7], (C,), jnp.float32)
    rm2 = jnp.zeros((C,), jnp.float32)
    rv2 = jnp.ones((C,), jnp.float32)
    eps = 1e-5
    s1 = g1 / jnp.sqrt(rv1 + eps)                                   # (2C,)
    b1 = be1 - rm1 * s1
    s2 = g2 / jnp.sqrt(rv2 + eps)                                   # (C,)
    b2 = be2 - rm2 * s2
    # Fold BN scales into the transposed 1x1-conv weights; bf16 MXU operands.
    w1t = (w1.T * s1[None, :]).astype(jnp.bfloat16)                 # (C, 2C)
    w2t = (w2.T * s2[None, :]).astype(jnp.bfloat16)                 # (2C, C)
    # PReLU alphas (default init 0.25, single shared parameter each).
    alphas = jnp.full((2,), 0.25, jnp.float32)
    return (w1t, w2t, b1.reshape(1, C2), b2.reshape(1, C), alphas)


def reference_forward(x_nct, params):
    """Pure-JAX reference mirroring the kernel math (eval-mode BN folded into
    bf16 weights, f32 accumulation / elementwise) for verification."""
    w1t, w2t, b1, b2, alphas = params
    x = jnp.transpose(x_nct, (0, 2, 1))                             # (B, T, C)
    h = jnp.einsum("btc,co->bto", x.astype(jnp.bfloat16), w1t,
                   preferred_element_type=jnp.float32)
    h = h + b1
    h = jnp.where(h > 0, h, alphas[0] * h)
    y = jnp.einsum("bto,oc->btc", h.astype(jnp.bfloat16), w2t,
                   preferred_element_type=jnp.float32)
    y = y + b2
    y = y + x
    y = jnp.where(y > 0, y, alphas[1] * y)
    B, T, C = y.shape
    t_out = T // 3
    y = y[:, : t_out * 3].reshape(B, t_out, 3, C).max(axis=2)
    return jnp.transpose(y, (0, 2, 1))                              # (B, C, T//3)


if __name__ == "__main__":
    # Small demo shapes; T not a multiple of 3 exercises the pool tail drop.
    B, C, T = 2, 4, 151
    key = jax.random.PRNGKey(0)
    kx, kp = jax.random.split(key)
    x = jax.random.normal(kx, (B, C, T), jnp.float32)
    params = make_params(kp, C)

    # Small tile cap so the demo also exercises multi-tile + padding paths.
    out = resnet_block_forward(x, params, t_tile_cap=48)
    out = jax.block_until_ready(out)

    ref = reference_forward(x, params)
    assert out.shape == (B, C, T // 3), out.shape
    assert jnp.allclose(out, ref, atol=1e-3, rtol=1e-3), "mismatch vs reference"
    print("KERNEL_OK")
</pallas_src>

<mosaic_0001>
module attributes {stable_mosaic.version = 11 : i64} {
  func.func @_resnet_block_kernel(%arg0: i32, %arg1: memref<48x4xf32, #tpu.memory_space<vmem>>, %arg2: memref<4x8xbf16, #tpu.memory_space<vmem>>, %arg3: memref<8x4xbf16, #tpu.memory_space<vmem>>, %arg4: memref<1x8xf32, #tpu.memory_space<vmem>>, %arg5: memref<1x4xf32, #tpu.memory_space<vmem>>, %arg6: memref<2xf32, #tpu.memory_space<smem>>, %arg7: memref<16x4xf32, #tpu.memory_space<vmem>>, %arg8: memref<48x4xf32, #tpu.memory_space<vmem>>) attributes {dimension_semantics = [#tpu.dimension_semantics<parallel>], iteration_bounds = array<i64: 8>, scalar_prefetch = 0 : i64, scratch_operands = 1 : i64, tpu.core_type = #tpu.core_type<tc>, window_params = [{transform_indices = @transform_0, window_bounds = array<i64: 48, 4>}, {pipeline_mode = #tpu.pipeline_mode<synchronous>, transform_indices = @transform_1, window_bounds = array<i64: 4, 8>}, {pipeline_mode = #tpu.pipeline_mode<synchronous>, transform_indices = @transform_2, window_bounds = array<i64: 8, 4>}, {pipeline_mode = #tpu.pipeline_mode<synchronous>, transform_indices = @transform_3, window_bounds = array<i64: 1, 8>}, {pipeline_mode = #tpu.pipeline_mode<synchronous>, transform_indices = @transform_4, window_bounds = array<i64: 1, 4>}, {transform_indices = @transform_5, window_bounds = array<i64: 2>}, {transform_indices = @transform_6, window_bounds = array<i64: 16, 4>}]} {
    %c0 = arith.constant 0 : index
    %c0_0 = arith.constant 0 : index
    %0 = vector.load %arg1[%c0, %c0_0] : memref<48x4xf32, #tpu.memory_space<vmem>>, vector<48x4xf32>
    %1 = arith.truncf %0 : vector<48x4xf32> to vector<48x4xbf16>
    %c0_1 = arith.constant 0 : index
    %c0_2 = arith.constant 0 : index
    %2 = vector.load %arg2[%c0_1, %c0_2] : memref<4x8xbf16, #tpu.memory_space<vmem>>, vector<4x8xbf16>
    %cst = arith.constant dense<0.000000e+00> : vector<48x8xf32>
    %3 = tpu.matmul %1, %2, %cst {dimension_numbers = #tpu.dot_dimension_numbers<[1], [0], [0], [1], [0, 0, 1, 1], [], []>} : vector<48x4xbf16>, vector<4x8xbf16>, vector<48x8xf32> -> vector<48x8xf32>
    %c0_3 = arith.constant 0 : index
    %c0_4 = arith.constant 0 : index
    %4 = vector.load %arg4[%c0_3, %c0_4] : memref<1x8xf32, #tpu.memory_space<vmem>>, vector<1x8xf32>
    %5 = vector.broadcast %4 : vector<1x8xf32> to vector<48x8xf32>
    %6 = arith.addf %3, %5 : vector<48x8xf32>
    %c0_5 = arith.constant 0 : index
    %7 = memref.load %arg6[%c0_5] : memref<2xf32, #tpu.memory_space<smem>>
    %cst_6 = arith.constant 0.000000e+00 : f32
    %8 = vector.broadcast %cst_6 : f32 to vector<48x8xf32>
    %9 = arith.cmpf ogt, %6, %8 : vector<48x8xf32>
    %10 = vector.broadcast %7 : f32 to vector<48x8xf32>
    %11 = arith.mulf %10, %6 : vector<48x8xf32>
    %12 = arith.select %9, %6, %11 : vector<48x8xi1>, vector<48x8xf32>
    %13 = arith.truncf %12 : vector<48x8xf32> to vector<48x8xbf16>
    %c0_7 = arith.constant 0 : index
    %c0_8 = arith.constant 0 : index
    %14 = vector.load %arg3[%c0_7, %c0_8] : memref<8x4xbf16, #tpu.memory_space<vmem>>, vector<8x4xbf16>
    %cst_9 = arith.constant dense<0.000000e+00> : vector<48x4xf32>
    %15 = tpu.matmul %13, %14, %cst_9 {dimension_numbers = #tpu.dot_dimension_numbers<[1], [0], [0], [1], [0, 0, 1, 1], [], []>} : vector<48x8xbf16>, vector<8x4xbf16>, vector<48x4xf32> -> vector<48x4xf32>
    %c0_10 = arith.constant 0 : index
    %c0_11 = arith.constant 0 : index
    %16 = vector.load %arg5[%c0_10, %c0_11] : memref<1x4xf32, #tpu.memory_space<vmem>>, vector<1x4xf32>
    %17 = vector.broadcast %16 : vector<1x4xf32> to vector<48x4xf32>
    %18 = arith.addf %15, %17 : vector<48x4xf32>
    %19 = arith.addf %18, %0 : vector<48x4xf32>
    %c1 = arith.constant 1 : index
    %20 = memref.load %arg6[%c1] : memref<2xf32, #tpu.memory_space<smem>>
    %cst_12 = arith.constant 0.000000e+00 : f32
    %21 = vector.broadcast %cst_12 : f32 to vector<48x4xf32>
    %22 = arith.cmpf ogt, %19, %21 : vector<48x4xf32>
    %23 = vector.broadcast %20 : f32 to vector<48x4xf32>
    %24 = arith.mulf %23, %19 : vector<48x4xf32>
    %25 = arith.select %22, %19, %24 : vector<48x4xi1>, vector<48x4xf32>
    %c0_13 = arith.constant 0 : index
    %c0_14 = arith.constant 0 : index
    %26 = vector.load %arg8[%c0_13, %c0_14] : memref<48x4xf32, #tpu.memory_space<vmem>>, vector<48x4xf32>
    tpu.vector_store %arg8[%c0_13, %c0_14], %25 {strides = array<i32>} : memref<48x4xf32, #tpu.memory_space<vmem>>, vector<48x4xf32>,
    %c0_15 = arith.constant 0 : index
    %c0_16 = arith.constant 0 : index
    %27 = tpu.strided_load %arg8[%c0_15, %c0_16] {strides = array<i32: 3, 1>} : memref<48x4xf32, #tpu.memory_space<vmem>>, vector<16x4xf32>
    %c1_17 = arith.constant 1 : index
    %c0_18 = arith.constant 0 : index
    %28 = tpu.strided_load %arg8[%c1_17, %c0_18] {strides = array<i32: 3, 1>} : memref<48x4xf32, #tpu.memory_space<vmem>>, vector<16x4xf32>
    %c2 = arith.constant 2 : index
    %c0_19 = arith.constant 0 : index
    %29 = tpu.strided_load %arg8[%c2, %c0_19] {strides = array<i32: 3, 1>} : memref<48x4xf32, #tpu.memory_space<vmem>>, vector<16x4xf32>
    %30 = arith.maximumf %27, %28 : vector<16x4xf32>
    %31 = arith.maximumf %30, %29 : vector<16x4xf32>
    %c0_20 = arith.constant 0 : index
    %c0_21 = arith.constant 0 : index
    %32 = vector.load %arg7[%c0_20, %c0_21] : memref<16x4xf32, #tpu.memory_space<vmem>>, vector<16x4xf32>
    tpu.vector_store %arg7[%c0_20, %c0_21], %31 {strides = array<i32>} : memref<16x4xf32, #tpu.memory_space<vmem>>, vector<16x4xf32>,
    return
  }
  func.func @transform_0(%arg0: i32) -> (i32, i32) {
    %c0_i32 = arith.constant 0 : i32
    %c0_i32_0 = arith.constant 0 : i32
    return %arg0, %c0_i32 : i32, i32
  }
  func.func @transform_1(%arg0: i32) -> (i32, i32) {
    %c0_i32 = arith.constant 0 : i32
    %c0_i32_0 = arith.constant 0 : i32
    %c0_i32_1 = arith.constant 0 : i32
    return %c0_i32, %c0_i32_0 : i32, i32
  }
  func.func @transform_2(%arg0: i32) -> (i32, i32) {
    %c0_i32 = arith.constant 0 : i32
    %c0_i32_0 = arith.constant 0 : i32
    %c0_i32_1 = arith.constant 0 : i32
    return %c0_i32, %c0_i32_0 : i32, i32
  }
  func.func @transform_3(%arg0: i32) -> (i32, i32) {
    %c0_i32 = arith.constant 0 : i32
    %c0_i32_0 = arith.constant 0 : i32
    %c0_i32_1 = arith.constant 0 : i32
    return %c0_i32, %c0_i32_0 : i32, i32
  }
  func.func @transform_4(%arg0: i32) -> (i32, i32) {
    %c0_i32 = arith.constant 0 : i32
    %c0_i32_0 = arith.constant 0 : i32
    %c0_i32_1 = arith.constant 0 : i32
    return %c0_i32, %c0_i32_0 : i32, i32
  }
  func.func @transform_5(%arg0: i32) -> i32 {
    %c0_i32 = arith.constant 0 : i32
    %c0_i32_0 = arith.constant 0 : i32
    return %c0_i32 : i32
  }
  func.func @transform_6(%arg0: i32) -> (i32, i32) {
    %c0_i32 = arith.constant 0 : i32
    %c0_i32_0 = arith.constant 0 : i32
    return %arg0, %c0_i32 : i32, i32
  }
}

</mosaic_0001>

<bundles_post_ra>
// kernel: resnet_block_forward.1
= control target key start
LH: loop header
LB: loop body
LE: loop exit
PB: predicated region body
PF: predicated region fallthrough
CT: control target
= control target key end

     0   :  { %11 = vsyncpa [#allocation4], 0  ;;  %s720_s21 = smov 0   ;;  %s823_s0 = inlined_call_operand.vmem [shape: f32[384,4], index: 0, kind: input, shape index: {}]   ;;  %s824_s1 = inlined_call_operand.vmem [shape: bf16[4,8], index: 1, kind: input, shape index: {}]   ;;  %s825_s2 = inlined_call_operand.vmem [shape: bf16[8,4], index: 2, kind: input, shape index: {}]   ;;  %s826_s3 = inlined_call_operand.vmem [shape: f32[1,8], index: 3, kind: input, shape index: {}]   ;;  %s827_s4 = inlined_call_operand.vmem [shape: f32[1,4], index: 4, kind: input, shape index: {}]   ;;  %s828_s5 = inlined_call_operand.vmem [shape: f32[2], index: 5, kind: input, shape index: {}]   ;;  %s829_s6 = inlined_call_operand.vmem [shape: f32[128,4], index: 6, kind: output, shape index: {}]  }
   0x1 LB: > { %s726_s22 = sadd.s32 4294967295, %s680_s21   ;;  %p579_p0 = scmp.ge.s32.totalorder %s680_s21, 1  ;;  %s680_s21 = sphi %s720_s21, %s17_s21  }
   0x2   : > { %p179_p1 = scmp.lt.s32.totalorder %s680_s21, 9  ;;  %s204_s25 = sshll.u32 %s828_s5, 4  ;;  %s205_s25 = int_to_ptr.vmem [resolvable:$true] %s204_s25 }
   0x3   : > { %p642_p3 = scmp.eq.s32.totalorder %s726_s22, 0  ;;  %s655_s27 = scalar_lea.vmem %s205_s25, 16 }
   0x4   : > { %p733_p2 = pnand %p579_p0, %p179_p1  ;;  %p656_p6 = scmp.ne.s32.totalorder %s205_s25, %s655_s27 }
   0x5   : > { %p663_p10 = scmp.lt.s32.totalorder %s205_s25, %s205_s25  ;;  %p664_p11 = scmp.lt.s32.totalorder %s655_s27, %s655_s27 }
   0x6   : > { %p638_p4 = pneg %p733_p2 }
   0x7   : > { %p665_p12 = por %p664_p11, %p663_p10 }
   0x8   : > { %p639_p5 = pnand %p642_p3, %p638_p4 }
   0xa   : > { %p657_p7 = pneg %p639_p5 }
   0xc   : > { %p658_p8 = pnand %p657_p7, %p656_p6 }
   0xe   : > { %p659_p9 = pneg %p658_p8 }
  0x10   : > { %p666_p13 = pnand %p665_p12, %p659_p9 }
  0x12   : > { %669 = shalt.err (!%p666_p13)
}
  0x13   : > { %s682_s28 = smov [#allocation3]   ;;  %226 = sbr.rel (%p733_p2) target bundleno = 510 (0x1fe), region = 44 }
  0x14   : > { %641 = dma.vmem_to_smem (!%p639_p5), %s205_s25, 16, %s682_s28, [#allocation4]  }
  0x1a   : > { %675 = dma.done.wait (%p642_p3), [#allocation4], 16  }
  0x1b   : > { %677 = vsyncadd (%p642_p3), [#allocation4], 4294967280 }
  0x1c   : > { %232 = sfence }
  0x1d   : > { %v279_v0 = vld [vmem:[%s824_s1] sm:$0x3]  ;;  %vm297_vm0 = vcmask 1041408   ;;  %s257_s7 = smul.u32 6, %s726_s22  ;;  %v683_v1 = vmov 0.0   ;;  %vm684_vm1 = vmmov 0  }
  0x1e   : > { %606 = vmatprep.subr.bf16.mxu0 %v683_v1  ;;  %v299_v2 = vsel %vm297_vm0, %v279_v0, 0  ;;  %608 = vmatprep.mubr.msk.bf16.mxu0 %vm684_vm1, %v683_v1  ;;  %vm287_vm2 = vcmask 31744   ;;  %v381_v12 = vld [vmem:[%s825_s2] sm:$0xf]  ;;  %vm399_vm3 = vcmask 1043456   ;;  %s358_s14 = sld [smem:[#allocation3]] }
  0x1f   : > { %607 = vmatpush3.bf16.msra.mxu0 %v299_v2  ;;  %p258_p0 = scmp.lt.s32.totalorder %s257_s7, 47  ;;  %620 = vmatprep.subr.bf16.mxu1 %v683_v1  ;;  %v401_v13 = vsel %vm399_vm3, %v381_v12, 0  ;;  %v587_v14 = vld [vmem:[%s826_s3] ss:$0 sm:$0xff]  ;;  %vm389_vm6 = vcmask 64512   ;;  %s595_s17 = sld [smem:[#allocation3 + $0x1]] }
  0x20   : > { %622 = vmatprep.mubr.msk.bf16.mxu1 %vm684_vm1, %v683_v1  ;;  %621 = vmatpush3.bf16.msra.mxu1 %v401_v13  ;;  %v591_v49 = vld [vmem:[%s827_s4] ss:$0 sm:$0xff]  ;;  %s585_s20 = sshll.u32 %s726_s22, 1 }
  0x21   : > { %s832_s7 = smov (!%p258_p0, %s257_s7), 47  ;;  %p264_p1 = scmp.lt.s32.totalorder %s585_s20, 15 }
  0x22   : > { %s584_s8 = sshll.u32 %s832_s7, 3 }
  0x23   : > { %s261_s11 = scalar_lea.vmem %s823_s0, %s584_s8  ;;  %s834_s20 = smov (!%p264_p1, %s585_s20), 15 }
  0x24   : > { %v761_v3 = vld [vmem:[%s261_s11] sm:$0xff]  ;;  %v763_v4 = vld [vmem:[%s261_s11 + $0x8] sm:$0xff]  ;;  %v770_v6 = vld [vmem:[%s261_s11 + $0x10] sm:$0xff]  ;;  %v365_v16 = vstv %s358_s14  ;;  %s586_s22 = sshll.u32 %s834_s20, 3 }
  0x25   : > { %v276_v5 = vpack.c.bf16 %v763_v4, %v761_v3  ;;  %v772_v7 = vld [vmem:[%s261_s11 + $0x18] sm:$0xff]  ;;  %v779_v9 = vld [vmem:[%s261_s11 + $0x20] sm:$0xff]  ;;  %v781_v10 = vld [vmem:[%s261_s11 + $0x28] sm:$0xff]  ;;  %v473_v53 = vstv %s595_s17  ;;  %s267_s25 = scalar_lea.vmem %s829_s6, %s586_s22 }
  0x26   : > { %v277_v8 = vpack.c.bf16 %v772_v7, %v770_v6  ;;  %v278_v11 = vpack.c.bf16 %v781_v10, %v779_v9 }
  0x27   : > { %609 = vmatmul.mubr.msk.bf16.vlgmr.msra.gmra.mrb[0].mxu0 %vm287_vm2, %v276_v5 }
  0x28   : > { %612 = vmatprep.mubr.msk.bf16.mxu0 %vm684_vm1, %v683_v1 }
  0x2f   : > { %613 = vmatmul.mubr.msk.bf16.gmra.mrb[4].mxu0 %vm287_vm2, %v277_v8 }
  0x30   : > { %616 = vmatprep.mubr.msk.bf16.mxu0 %vm684_vm1, %v683_v1 }
  0x37   : > { %617 = vmatmul.mubr.msk.bf16.gmra.mrb[8].mxu0 %vm287_vm2, %v278_v11 }
  0xfa   : > { %v335_v15 = vpop.f32.mrb[0].mxu0 }
  0xfb   : > { %v336_v17 = vadd.f32 %v587_v14, %v335_v15  ;;  %v610_v18 = vpop.f32.mrb[1].mxu0 }
  0xfc   : > { %v338_v19 = vpop.f32.mrb[2].mxu0 }
  0xfd   : > { %v366_v20 = vmul.f32 %v365_v16, %v336_v17  ;;  %v339_v21 = vadd.f32 %v587_v14, %v338_v19  ;;  %v611_v22 = vpop.f32.mrb[3].mxu0  ;;  %vm359_vm4 = vcmp.gt.f32.partialorder %v336_v17, 0.0 }
  0xff   : > { %vm360_vm5 = vcmp.gt.f32.partialorder %v339_v21, 0.0  ;;  %v367_v23 = vmul.f32 %v365_v16, %v339_v21  ;;  %v372_v24 = vsel %vm359_vm4, %v336_v17, %v366_v20 }
 0x101   : > { %v373_v25 = vsel %vm360_vm5, %v339_v21, %v367_v23 }
 0x102   : > { %v378_v26 = vpack.c.bf16 %v373_v25, %v372_v24  ;;  %v343_v27 = vpop.f32.mrb[4].mxu0 }
 0x103   : > { %v344_v28 = vadd.f32 %v587_v14, %v343_v27  ;;  %v614_v29 = vpop.f32.mrb[5].mxu0 }
 0x104   : > { %v346_v30 = vpop.f32.mrb[6].mxu0  ;;  %623 = vmatmul.mubr.msk.bf16.vlgmr.msra.gmra.mrb[0].mxu1 %vm389_vm6, %v378_v26 }
 0x105   : > { %v368_v31 = vmul.f32 %v365_v16, %v344_v28  ;;  %v347_v32 = vadd.f32 %v587_v14, %v346_v30  ;;  %v615_v33 = vpop.f32.mrb[7].mxu0  ;;  %626 = vmatprep.mubr.msk.bf16.mxu1 %vm684_vm1, %v683_v1  ;;  %vm361_vm7 = vcmp.gt.f32.partialorder %v344_v28, 0.0 }
 0x107   : > { %vm362_vm8 = vcmp.gt.f32.partialorder %v347_v32, 0.0  ;;  %v369_v34 = vmul.f32 %v365_v16, %v347_v32  ;;  %v374_v35 = vsel %vm361_vm7, %v344_v28, %v368_v31 }
 0x109   : > { %v375_v36 = vsel %vm362_vm8, %v347_v32, %v369_v34 }
 0x10a   : > { %v379_v37 = vpack.c.bf16 %v375_v36, %v374_v35  ;;  %v351_v38 = vpop.f32.mrb[8].mxu0 }
 0x10b   : > { %v352_v39 = vadd.f32 %v587_v14, %v351_v38  ;;  %v618_v40 = vpop.f32.mrb[9].mxu0 }
 0x10c   : > { %v354_v41 = vpop.f32.mrb[10].mxu0  ;;  %627 = vmatmul.mubr.msk.bf16.gmra.mrb[4].mxu1 %vm389_vm6, %v379_v37 }
 0x10d   : > { %v370_v42 = vmul.f32 %v365_v16, %v352_v39  ;;  %v355_v43 = vadd.f32 %v587_v14, %v354_v41  ;;  %v619_v44 = vpop.f32.mrb[11].mxu0  ;;  %630 = vmatprep.mubr.msk.bf16.mxu1 %vm684_vm1, %v683_v1  ;;  %vm363_vm9 = vcmp.gt.f32.partialorder %v352_v39, 0.0 }
 0x10f   : > { %vm364_vm10 = vcmp.gt.f32.partialorder %v355_v43, 0.0  ;;  %v371_v45 = vmul.f32 %v365_v16, %v355_v43  ;;  %v376_v46 = vsel %vm363_vm9, %v352_v39, %v370_v42 }
 0x111   : > { %v377_v47 = vsel %vm364_vm10, %v355_v43, %v371_v45 }
 0x112   : > { %v380_v48 = vpack.c.bf16 %v377_v47, %v376_v46 }
 0x114   : > { %631 = vmatmul.mubr.msk.bf16.gmra.mrb[8].mxu1 %vm389_vm6, %v380_v48 }
 0x1d7   : > { %v437_v50 = vpop.f32.mrb[0].mxu1 }
 0x1d8   : > { %v438_v51 = vadd.f32 %v591_v49, %v437_v50  ;;  %v624_v52 = vpop.f32.mrb[1].mxu1 }
 0x1d9   : > { %v440_v54 = vpop.f32.mrb[2].mxu1 }
 0x1da   : > { %v460_v55 = vadd.f32 %v438_v51, %v761_v3  ;;  %v441_v56 = vadd.f32 %v591_v49, %v440_v54  ;;  %v625_v57 = vpop.f32.mrb[3].mxu1 }
 0x1dc   : > { %vm467_vm11 = vcmp.gt.f32.partialorder %v460_v55, 0.0  ;;  %v474_v58 = vmul.f32 %v473_v53, %v460_v55  ;;  %v461_v59 = vadd.f32 %v441_v56, %v763_v4 }
 0x1de   : > { %v480_v60 = vsel %vm467_vm11, %v460_v55, %v474_v58  ;;  %vm468_vm12 = vcmp.gt.f32.partialorder %v461_v59, 0.0  ;;  %v475_v61 = vmul.f32 %v473_v53, %v461_v59 }
 0x1df   : > { %486 = vst.msk [vmem:[#allocation2] sm:$0xff] %vm287_vm2, %v480_v60  ;;  %v445_v62 = vpop.f32.mrb[4].mxu1 }
 0x1e0   : > { %v481_v63 = vsel %vm468_vm12, %v461_v59, %v475_v61  ;;  %v446_v0 = vadd.f32 %v591_v49, %v445_v62  ;;  %v628_v1 = vpop.f32.mrb[5].mxu1 }
 0x1e1   : > { %487 = vst.msk [vmem:[#allocation2 + $0x8] sm:$0xff] %vm287_vm2, %v481_v63  ;;  %v448_v2 = vpop.f32.mrb[6].mxu1 }
 0x1e2   : > { %v462_v3 = vadd.f32 %v446_v0, %v770_v6  ;;  %v449_v5 = vadd.f32 %v591_v49, %v448_v2  ;;  %v629_v8 = vpop.f32.mrb[7].mxu1 }
 0x1e4   : > { %vm469_vm13 = vcmp.gt.f32.partialorder %v462_v3, 0.0  ;;  %v476_v11 = vmul.f32 %v473_v53, %v462_v3  ;;  %v463_v4 = vadd.f32 %v449_v5, %v772_v7 }
 0x1e6   : > { %v482_v12 = vsel %vm469_vm13, %v462_v3, %v476_v11  ;;  %vm470_vm14 = vcmp.gt.f32.partialorder %v463_v4, 0.0  ;;  %v477_v13 = vmul.f32 %v473_v53, %v463_v4 }
 0x1e7   : > { %488 = vst.msk [vmem:[#allocation2 + $0x10] sm:$0xff] %vm287_vm2, %v482_v12  ;;  %v453_v14 = vpop.f32.mrb[8].mxu1 }
 0x1e8   : > { %v483_v15 = vsel %vm470_vm14, %v463_v4, %v477_v13  ;;  %v454_v16 = vadd.f32 %v591_v49, %v453_v14  ;;  %v632_v17 = vpop.f32.mrb[9].mxu1 }
 0x1e9   : > { %489 = vst.msk [vmem:[#allocation2 + $0x18] sm:$0xff] %vm287_vm2, %v483_v15  ;;  %v456_v6 = vpop.f32.mrb[10].mxu1 }
 0x1ea   : > { %v464_v18 = vadd.f32 %v454_v16, %v779_v9  ;;  %v457_v19 = vadd.f32 %v591_v49, %v456_v6  ;;  %v633_v20 = vpop.f32.mrb[11].mxu1 }
 0x1ec   : > { %vm471_vm15 = vcmp.gt.f32.partialorder %v464_v18, 0.0  ;;  %v478_v7 = vmul.f32 %v473_v53, %v464_v18  ;;  %v465_v21 = vadd.f32 %v457_v19, %v781_v10 }
 0x1ee   : > { %v492_v22 = vld [vmem:[#allocation2] ss:$3 sm:$0xff]  ;;  %v496_v23 = vld [vmem:[#allocation2 + $0x1] ss:$3 sm:$0xff]  ;;  %v484_v24 = vsel %vm471_vm15, %v464_v18, %v478_v7  ;;  %v479_v25 = vmul.f32 %v473_v53, %v465_v21  ;;  %vm472_vm0 = vcmp.gt.f32.partialorder %v465_v21, 0.0 }
 0x1ef   : > { %v503_v26 = vmax.f32 %v492_v22, %v496_v23  ;;  %490 = vst.msk [vmem:[#allocation2 + $0x20] sm:$0xff] %vm287_vm2, %v484_v24  ;;  %v500_v9 = vld [vmem:[#allocation2 + $0x2] ss:$3 sm:$0xff] }
 0x1f0   : > { %v485_v27 = vsel %vm472_vm0, %v465_v21, %v479_v25 }
 0x1f1   : > { %v505_v28 = vmax.f32 %v503_v26, %v500_v9  ;;  %491 = vst.msk [vmem:[#allocation2 + $0x28] sm:$0xff] %vm287_vm2, %v485_v27 }
 0x1f3   : > { %507 = vst.msk [vmem:[%s267_s25] sm:$0xff] %vm287_vm2, %v505_v28 }
 0x1f8   : > { %v494_v10 = vld [vmem:[#allocation2 + $0x18] ss:$3 sm:$0xff]  ;;  %v498_v29 = vld [vmem:[#allocation2 + $0x19] ss:$3 sm:$0xff]  ;;  %v502_v31 = vld [vmem:[#allocation2 + $0x1a] ss:$3 sm:$0xff] }
 0x1f9   : > { %v504_v30 = vmax.f32 %v494_v10, %v498_v29 }
 0x1fb   : > { %v506_v32 = vmax.f32 %v504_v30, %v502_v31 }
 0x1fd   : > { %508 = vst.msk [vmem:[%s267_s25 + $0x8] sm:$0xff] %vm287_vm2, %v506_v32 }
 0x1fe PF: > { %s17_s21 = sadd.s32 1, %s680_s21  }
 0x1ff   : > { %p14_p2 = scmp.ge.s32.totalorder %s17_s21, 10  }
 0x201   :  { %16 = sbr.rel (!%p14_p2) target bundleno = 1 (0x1), region = 84 }
 0x208   :  { %531 = vsyncpa [#allocation4], 1 }
 0x209   :  { %533 = vsyncpa [#allocation4 + $0x1], 1 }

</bundles_post_ra>
